<compile_context>
chip_gen: v5e
topology: v5e:2x2
jax: 0.10.0
libtpu: 0.0.40
codegen_flags: <defaults>
</compile_context>

<pallas_src>
import jax
import jax.numpy as jnp
from jax.experimental import pallas as pl
from jax.experimental.pallas import tpu as pltpu


def _mlp_kernel(x_ref, *rest):
    """Fused MLP: relu(x @ W0 + b0) @ W1 + b1 ... @ Wn + bn.

    rest = (w0, b0, w1, b1, ..., wn, bn, out_ref)
    """
    out_ref = rest[-1]
    wb = rest[:-1]
    n_layers = len(wb) // 2

    h = x_ref[...]
    for i in range(n_layers):
        w_ref = wb[2 * i]
        b_ref = wb[2 * i + 1]
        # MXU operands in the weights' dtype (bf16 x bf16 -> f32 is the fast
        # native path; f32 stays f32).  Accumulation is always f32.
        lhs = h if h.dtype == w_ref.dtype else h.astype(w_ref.dtype)
        acc = jnp.dot(lhs, w_ref[...], preferred_element_type=jnp.float32)
        acc = acc + b_ref[...].astype(jnp.float32)
        if i < n_layers - 1:
            acc = jnp.maximum(acc, 0.0)      # ReLU (Dropout(0) == identity)
        h = acc
    out_ref[...] = h.astype(out_ref.dtype)


def _round_up(x, m):
    return ((x + m - 1) // m) * m


def mlp_pallas(x, weights, biases, *, tile_m=1024, use_bf16_compute=False,
               single_buffer_params=None):
    """Apply the MLP to x of shape (..., in_dim).

    weights[i]: (dims[i], dims[i+1])   (transposed vs. PyTorch nn.Linear)
    biases[i] : (dims[i+1],)
    tile_m    : rows per grid step (sweepable); capped to the rounded batch.
    use_bf16_compute: pre-cast params to bf16 and run the matmuls on the bf16
                MXU path (f32 accumulation).  Slight numeric divergence from
                the f32 reference; off by default.
    single_buffer_params: force single-buffered VMEM-resident params.  None =
                auto (only when params are large; a v7x VMEM saver).
    """
    out_dtype = x.dtype
    in_dim = x.shape[-1]
    lead_shape = x.shape[:-1]
    out_dim = weights[-1].shape[1]

    x2 = x.reshape(-1, in_dim)
    m = x2.shape[0]

    weights = list(weights)
    biases = [b.reshape(1, -1) for b in biases]
    if use_bf16_compute:
        weights = [w.astype(jnp.bfloat16) for w in weights]
        biases = [b.astype(jnp.bfloat16) for b in biases]

    # ---- tile_m selection ------------------------------------------------
    # Sublane granularity of the x block: 8 rows for 4-byte dtypes, 16 for 2B.
    sub = 16 if x2.dtype.itemsize == 2 else 8
    tile_m = max(sub, _round_up(min(tile_m, _round_up(m, sub)), sub))
    # Megacore (v7x): ensure >= 2 grid steps when m is large enough to split
    # without dropping below ~512-row tiles.
    if pl.cdiv(m, tile_m) < 2 and m >= 2 * 512:
        tile_m = _round_up(pl.cdiv(m, 2), sub)
    grid = (pl.cdiv(m, tile_m),)

    # ---- parameter operands (whole-block VMEM resident, fetched once) -----
    param_bytes = (sum(w.size * w.dtype.itemsize for w in weights)
                   + sum(b.size * b.dtype.itemsize for b in biases))
    if single_buffer_params is None:
        # Double-buffering constant-index params is pure VMEM waste; only
        # bother overriding when they are big enough to matter (v7x: 64 MiB).
        single_buffer_params = param_bytes > (8 << 20)

    wb_args, wb_specs = [], []
    for w, b in zip(weights, biases):
        wb_args.extend([w, b])
        if single_buffer_params:
            wb_specs.append(pl.BlockSpec(w.shape, lambda i: (0, 0),
                                         pipeline_mode=pl.Buffered(1)))
            wb_specs.append(pl.BlockSpec(b.shape, lambda i: (0, 0),
                                         pipeline_mode=pl.Buffered(1)))
        else:
            wb_specs.append(pl.BlockSpec(w.shape, lambda i: (0, 0)))
            wb_specs.append(pl.BlockSpec(b.shape, lambda i: (0, 0)))

    # ---- cost estimate for XLA's scheduler --------------------------------
    dims = [in_dim] + [w.shape[1] for w in weights]
    m_work = grid[0] * tile_m
    flops = 2 * m_work * sum(k * n for k, n in zip(dims[:-1], dims[1:]))
    bytes_accessed = int(m * in_dim * x2.dtype.itemsize
                         + param_bytes
                         + m * out_dim * jnp.dtype(out_dtype).itemsize)
    cost = pl.CostEstimate(flops=int(flops), transcendentals=0,
                           bytes_accessed=bytes_accessed)

    # ---- VMEM budget: generous, clamped below physical VMEM ---------------
    blk_bytes = (tile_m * in_dim * x2.dtype.itemsize
                 + tile_m * out_dim * jnp.dtype(out_dtype).itemsize)
    inter_bytes = 3 * tile_m * max(dims) * 4
    param_buf_bytes = (1 if single_buffer_params else 2) * param_bytes
    vmem_est = 2 * blk_bytes + param_buf_bytes + inter_bytes
    try:
        phys_vmem = int(pltpu.get_tpu_info().vmem_capacity_bytes)
    except Exception:
        phys_vmem = 64 * 1024 * 1024        # conservative (v7x per-TC size)
    vmem_limit = int(min(max(2 * vmem_est, 32 * 1024 * 1024),
                         int(0.85 * phys_vmem)))

    out = pl.pallas_call(
        _mlp_kernel,
        out_shape=jax.ShapeDtypeStruct((m, out_dim), out_dtype),
        grid_spec=pltpu.PrefetchScalarGridSpec(
            num_scalar_prefetch=0,
            grid=grid,
            in_specs=[pl.BlockSpec((tile_m, in_dim), lambda i: (i, 0))]
                     + wb_specs,
            out_specs=pl.BlockSpec((tile_m, out_dim), lambda i: (i, 0)),
        ),
        compiler_params=pltpu.CompilerParams(
            dimension_semantics=("parallel",),
            vmem_limit_bytes=vmem_limit),
        cost_estimate=cost,
    )(x2, *wb_args)

    return out.reshape(*lead_shape, out_dim)


def init_mlp_params(key, in_dim, out_dim, hidden_list, dtype=jnp.float32):
    """Deterministic synthetic init (PyTorch-Linear-style uniform bounds)."""
    dims = [in_dim] + list(hidden_list) + [out_dim]
    weights, biases = [], []
    for i in range(len(dims) - 1):
        key, kw, kb = jax.random.split(key, 3)
        bound = 1.0 / jnp.sqrt(dims[i])
        w = jax.random.uniform(kw, (dims[i], dims[i + 1]), dtype,
                               minval=-bound, maxval=bound)
        b = jax.random.uniform(kb, (dims[i + 1],), dtype,
                               minval=-bound, maxval=bound)
        weights.append(w)
        biases.append(b)
    return weights, biases


def mlp_reference(x, weights, biases):
    """Pure-JAX reference matching the PyTorch forward."""
    lead = x.shape[:-1]
    h = x.reshape(-1, x.shape[-1])
    n = len(weights)
    for i in range(n):
        h = h @ weights[i] + biases[i]
        if i < n - 1:
            h = jnp.maximum(h, 0.0)
    return h.reshape(*lead, -1)


if __name__ == "__main__":
    # Shapes consistent with MLP(in_dim=32, out_dim=16, hidden_list=[64, 64])
    in_dim, out_dim, hidden_list = 32, 16, [64, 64]

    key = jax.random.PRNGKey(0)
    key, kx1, kx2 = jax.random.split(key, 3)
    weights, biases = init_mlp_params(key, in_dim, out_dim, hidden_list)

    # Case 1: small (batch=2, seq=8) -> single grid step, tile capped to m.
    x1 = jax.random.normal(kx1, (2, 8, in_dim), dtype=jnp.float32)
    y1 = jax.block_until_ready(mlp_pallas(x1, weights, biases))
    y1_ref = mlp_reference(x1, weights, biases)
    assert y1.shape == (2, 8, out_dim), y1.shape
    assert jnp.allclose(y1, y1_ref, atol=5e-5, rtol=5e-5), \
        float(jnp.max(jnp.abs(y1 - y1_ref)))

    # Case 2: M (=602) not a multiple of tile_m -> multi-step grid with a
    # masked partial last tile (no wrapper-side pad/slice passes).
    x2 = jax.random.normal(kx2, (2, 301, in_dim), dtype=jnp.float32)
    y2 = jax.block_until_ready(mlp_pallas(x2, weights, biases, tile_m=256))
    y2_ref = mlp_reference(x2, weights, biases)
    assert y2.shape == (2, 301, out_dim), y2.shape
    assert jnp.allclose(y2, y2_ref, atol=5e-5, rtol=5e-5), \
        float(jnp.max(jnp.abs(y2 - y2_ref)))

    # Case 3: bf16 compute path (default tile_m), looser tolerance vs f32 ref.
    y3 = jax.block_until_ready(
        mlp_pallas(x2, weights, biases, use_bf16_compute=True))
    y3_ref = mlp_reference(x2, weights, biases)
    assert y3.shape == (2, 301, out_dim), y3.shape
    assert jnp.allclose(y3, y3_ref, atol=5e-2, rtol=5e-2), \
        float(jnp.max(jnp.abs(y3 - y3_ref)))

    print("KERNEL_OK")
</pallas_src>

<mosaic_0001>
module attributes {stable_mosaic.version = 11 : i64} {
  func.func @_mlp_kernel(%arg0: i32, %arg1: memref<16x32xf32, #tpu.memory_space<vmem>>, %arg2: memref<32x64xf32, #tpu.memory_space<vmem>>, %arg3: memref<1x64xf32, #tpu.memory_space<vmem>>, %arg4: memref<64x64xf32, #tpu.memory_space<vmem>>, %arg5: memref<1x64xf32, #tpu.memory_space<vmem>>, %arg6: memref<64x16xf32, #tpu.memory_space<vmem>>, %arg7: memref<1x16xf32, #tpu.memory_space<vmem>>, %arg8: memref<16x16xf32, #tpu.memory_space<vmem>>) attributes {dimension_semantics = [#tpu.dimension_semantics<parallel>], iteration_bounds = array<i64: 1>, scalar_prefetch = 0 : i64, scratch_operands = 0 : i64, tpu.core_type = #tpu.core_type<tc>, window_params = [{transform_indices = @transform_0, window_bounds = array<i64: 16, 32>}, {pipeline_mode = #tpu.pipeline_mode<synchronous>, transform_indices = @transform_1, window_bounds = array<i64: 32, 64>}, {pipeline_mode = #tpu.pipeline_mode<synchronous>, transform_indices = @transform_2, window_bounds = array<i64: 1, 64>}, {pipeline_mode = #tpu.pipeline_mode<synchronous>, transform_indices = @transform_3, window_bounds = array<i64: 64, 64>}, {pipeline_mode = #tpu.pipeline_mode<synchronous>, transform_indices = @transform_4, window_bounds = array<i64: 1, 64>}, {pipeline_mode = #tpu.pipeline_mode<synchronous>, transform_indices = @transform_5, window_bounds = array<i64: 64, 16>}, {pipeline_mode = #tpu.pipeline_mode<synchronous>, transform_indices = @transform_6, window_bounds = array<i64: 1, 16>}, {transform_indices = @transform_7, window_bounds = array<i64: 16, 16>}]} {
    %c0 = arith.constant 0 : index
    %c0_0 = arith.constant 0 : index
    %0 = vector.load %arg1[%c0, %c0_0] : memref<16x32xf32, #tpu.memory_space<vmem>>, vector<16x32xf32>
    %c0_1 = arith.constant 0 : index
    %c0_2 = arith.constant 0 : index
    %1 = vector.load %arg2[%c0_1, %c0_2] : memref<32x64xf32, #tpu.memory_space<vmem>>, vector<32x64xf32>
    %cst = arith.constant dense<0.000000e+00> : vector<16x64xf32>
    %2 = tpu.matmul %0, %1, %cst {dimension_numbers = #tpu.dot_dimension_numbers<[1], [0], [0], [1], [0, 0, 1, 1], [], []>} : vector<16x32xf32>, vector<32x64xf32>, vector<16x64xf32> -> vector<16x64xf32>
    %c0_3 = arith.constant 0 : index
    %c0_4 = arith.constant 0 : index
    %3 = vector.load %arg3[%c0_3, %c0_4] : memref<1x64xf32, #tpu.memory_space<vmem>>, vector<1x64xf32>
    %4 = vector.broadcast %3 : vector<1x64xf32> to vector<16x64xf32>
    %5 = arith.addf %2, %4 : vector<16x64xf32>
    %cst_5 = arith.constant 0.000000e+00 : f32
    %6 = vector.broadcast %cst_5 : f32 to vector<16x64xf32>
    %7 = arith.maximumf %5, %6 : vector<16x64xf32>
    %c0_6 = arith.constant 0 : index
    %c0_7 = arith.constant 0 : index
    %8 = vector.load %arg4[%c0_6, %c0_7] : memref<64x64xf32, #tpu.memory_space<vmem>>, vector<64x64xf32>
    %cst_8 = arith.constant dense<0.000000e+00> : vector<16x64xf32>
    %9 = tpu.matmul %7, %8, %cst_8 {dimension_numbers = #tpu.dot_dimension_numbers<[1], [0], [0], [1], [0, 0, 1, 1], [], []>} : vector<16x64xf32>, vector<64x64xf32>, vector<16x64xf32> -> vector<16x64xf32>
    %c0_9 = arith.constant 0 : index
    %c0_10 = arith.constant 0 : index
    %10 = vector.load %arg5[%c0_9, %c0_10] : memref<1x64xf32, #tpu.memory_space<vmem>>, vector<1x64xf32>
    %11 = vector.broadcast %10 : vector<1x64xf32> to vector<16x64xf32>
    %12 = arith.addf %9, %11 : vector<16x64xf32>
    %cst_11 = arith.constant 0.000000e+00 : f32
    %13 = vector.broadcast %cst_11 : f32 to vector<16x64xf32>
    %14 = arith.maximumf %12, %13 : vector<16x64xf32>
    %c0_12 = arith.constant 0 : index
    %c0_13 = arith.constant 0 : index
    %15 = vector.load %arg6[%c0_12, %c0_13] : memref<64x16xf32, #tpu.memory_space<vmem>>, vector<64x16xf32>
    %cst_14 = arith.constant dense<0.000000e+00> : vector<16x16xf32>
    %16 = tpu.matmul %14, %15, %cst_14 {dimension_numbers = #tpu.dot_dimension_numbers<[1], [0], [0], [1], [0, 0, 1, 1], [], []>} : vector<16x64xf32>, vector<64x16xf32>, vector<16x16xf32> -> vector<16x16xf32>
    %c0_15 = arith.constant 0 : index
    %c0_16 = arith.constant 0 : index
    %17 = vector.load %arg7[%c0_15, %c0_16] : memref<1x16xf32, #tpu.memory_space<vmem>>, vector<1x16xf32>
    %18 = vector.broadcast %17 : vector<1x16xf32> to vector<16x16xf32>
    %19 = arith.addf %16, %18 : vector<16x16xf32>
    %c0_17 = arith.constant 0 : index
    %c0_18 = arith.constant 0 : index
    %20 = vector.load %arg8[%c0_17, %c0_18] : memref<16x16xf32, #tpu.memory_space<vmem>>, vector<16x16xf32>
    tpu.vector_store %arg8[%c0_17, %c0_18], %19 {strides = array<i32>} : memref<16x16xf32, #tpu.memory_space<vmem>>, vector<16x16xf32>,
    return
  }
  func.func @transform_0(%arg0: i32) -> (i32, i32) {
    %c0_i32 = arith.constant 0 : i32
    %c0_i32_0 = arith.constant 0 : i32
    return %arg0, %c0_i32 : i32, i32
  }
  func.func @transform_1(%arg0: i32) -> (i32, i32) {
    %c0_i32 = arith.constant 0 : i32
    %c0_i32_0 = arith.constant 0 : i32
    %c0_i32_1 = arith.constant 0 : i32
    return %c0_i32, %c0_i32_0 : i32, i32
  }
  func.func @transform_2(%arg0: i32) -> (i32, i32) {
    %c0_i32 = arith.constant 0 : i32
    %c0_i32_0 = arith.constant 0 : i32
    %c0_i32_1 = arith.constant 0 : i32
    return %c0_i32, %c0_i32_0 : i32, i32
  }
  func.func @transform_3(%arg0: i32) -> (i32, i32) {
    %c0_i32 = arith.constant 0 : i32
    %c0_i32_0 = arith.constant 0 : i32
    %c0_i32_1 = arith.constant 0 : i32
    return %c0_i32, %c0_i32_0 : i32, i32
  }
  func.func @transform_4(%arg0: i32) -> (i32, i32) {
    %c0_i32 = arith.constant 0 : i32
    %c0_i32_0 = arith.constant 0 : i32
    %c0_i32_1 = arith.constant 0 : i32
    return %c0_i32, %c0_i32_0 : i32, i32
  }
  func.func @transform_5(%arg0: i32) -> (i32, i32) {
    %c0_i32 = arith.constant 0 : i32
    %c0_i32_0 = arith.constant 0 : i32
    %c0_i32_1 = arith.constant 0 : i32
    return %c0_i32, %c0_i32_0 : i32, i32
  }
  func.func @transform_6(%arg0: i32) -> (i32, i32) {
    %c0_i32 = arith.constant 0 : i32
    %c0_i32_0 = arith.constant 0 : i32
    %c0_i32_1 = arith.constant 0 : i32
    return %c0_i32, %c0_i32_0 : i32, i32
  }
  func.func @transform_7(%arg0: i32) -> (i32, i32) {
    %c0_i32 = arith.constant 0 : i32
    %c0_i32_0 = arith.constant 0 : i32
    return %arg0, %c0_i32 : i32, i32
  }
}

</mosaic_0001>

<bundles_post_ra>
// kernel: tpu_custom_call.1
= control target key start
LH: loop header
LB: loop body
LE: loop exit
PB: predicated region body
PF: predicated region fallthrough
CT: control target
= control target key end

     0   :  { %12 = vsyncpa [#allocation3], 0  ;;  %s388_s0 = inlined_call_operand.vmem [shape: f32[16,32], index: 0, kind: input, shape index: {}]   ;;  %s389_s1 = inlined_call_operand.hbm [shape: f32[32,64], index: 1, kind: input, shape index: {}]   ;;  %s390_s2 = inlined_call_operand.vmem [shape: f32[1,64], index: 2, kind: input, shape index: {}]   ;;  %s391_s3 = inlined_call_operand.vmem [shape: f32[64,64], index: 3, kind: input, shape index: {}]   ;;  %s392_s4 = inlined_call_operand.vmem [shape: f32[1,64], index: 4, kind: input, shape index: {}]   ;;  %s393_s5 = inlined_call_operand.vmem [shape: f32[64,16], index: 5, kind: input, shape index: {}]   ;;  %s394_s6 = inlined_call_operand.vmem [shape: f32[1,16], index: 6, kind: input, shape index: {}]   ;;  %s395_s7 = inlined_call_operand.hbm [shape: f32[16,16], index: 7, kind: output, shape index: {}]  }
   0x1   :  { %13 = vsyncpa [#allocation4], 0  ;;  %s20_s26 = sshll.u32 %s389_s1, 4  ;;  %s265_s27 = smov [#allocation2]   ;;  %s21_s26 = int_to_ptr.hbm [resolvable:$true] %s20_s26 }
   0x2   :  { %s22_s28 = sshll.u32 %s265_s27, 4  ;;  %s266_s29 = smov 128   ;;  %s23_s28 = int_to_ptr.vmem [resolvable:$true] %s22_s28 }
   0x3   :  { %s267_s30 = smov 8  }
   0x4   :  { %28 = dma.hbm_to_vmem [thread:$0]  %s21_s26, 512, %s23_s28, [#allocation3], %s266_s29, %s266_s29, %s267_s30  }
   0x5   :  { %261 = dma.done.wait [#allocation3], 512  }
   0x6   :  { %262 = vsyncadd [#allocation3], 4294966784  ;;  %v48_v0 = vld [vmem:[#allocation2 + $0x18] sm:$0xff]  ;;  %v47_v1 = vld [vmem:[#allocation2 + $0x10] sm:$0xff]  ;;  %vm53_vm0 = vcmask 261120   ;;  %vm97_vm1 = vcmask 523264  }
   0x7   :  { %72 = vmatpush.msra.mxu0 %v48_v0  ;;  %v46_v2 = vld [vmem:[#allocation2 + $0x8] sm:$0xff]  ;;  %v92_v3 = vld [vmem:[%s391_s3 + $0x38] sm:$0xff]  ;;  %v91_v4 = vld [vmem:[%s391_s3 + $0x30] sm:$0xff]  ;;  %vm170_vm2 = vcmask 130048   ;;  %s179_s26 = sshll.u32 %s395_s7, 4  ;;  %s180_s26 = int_to_ptr.hbm [resolvable:$true] %s179_s26 }
   0x8   :  { %v45_v5 = vld [vmem:[#allocation2] sm:$0xff]  ;;  %112 = vmatpush.msra.mxu1 %v92_v3  ;;  %v90_v6 = vld [vmem:[%s391_s3 + $0x28] sm:$0xff]  ;;  %198 = vmatpush.msra.mxu3 %v92_v3  ;;  %v88_v9 = vld [vmem:[%s391_s3 + $0x18] sm:$0xff] }
   0x9   :  { %73 = vmatpush.msra.mxu0 %v47_v1  ;;  %v43_v7 = vld [vmem:[%s388_s0] sm:$0xff]  ;;  %v44_v10 = vld [vmem:[%s388_s0 + $0x8] sm:$0xff]  ;;  %v87_v11 = vld [vmem:[%s391_s3 + $0x10] sm:$0xff] }
   0xa   :  { %113 = vmatpush.msra.mxu1 %v91_v4  ;;  %v89_v8 = vld [vmem:[%s391_s3 + $0x20] sm:$0xff]  ;;  %199 = vmatpush.msra.mxu3 %v91_v4  ;;  %v86_v12 = vld [vmem:[%s391_s3 + $0x8] sm:$0xff]  ;;  %v136_v14 = vld [vmem:[%s393_s5 + $0x38] sm:$0xff] }
   0xb   :  { %74 = vmatpush.msra.mxu0 %v46_v2  ;;  %v85_v13 = vld [vmem:[%s391_s3] sm:$0xff]  ;;  %v135_v15 = vld [vmem:[%s393_s5 + $0x30] sm:$0xff]  ;;  %155 = vmatpush.msra.mxu2 %v136_v14  ;;  %v134_v16 = vld [vmem:[%s393_s5 + $0x28] sm:$0xff] }
   0xc   :  { %114 = vmatpush.msra.mxu1 %v90_v6  ;;  %200 = vmatpush.msra.mxu3 %v90_v6  ;;  %v133_v17 = vld [vmem:[%s393_s5 + $0x20] sm:$0xff]  ;;  %v132_v18 = vld [vmem:[%s393_s5 + $0x18] sm:$0xff]  ;;  %v131_v26 = vld [vmem:[%s393_s5 + $0x10] sm:$0xff] }
   0xd   :  { %75 = vmatpush.msra.mxu0 %v45_v5  ;;  %156 = vmatpush.msra.mxu2 %v135_v15  ;;  %v210_v19 = vld [vmem:[%s390_s2] ss:$0 sm:$0xff]  ;;  %v130_v27 = vld [vmem:[%s393_s5 + $0x8] sm:$0xff] }
   0xe   :  { %192 = vmatmul.msk.f32.vlgmr.msra.gmra.mxu0 %vm53_vm0, %v43_v7  ;;  %115 = vmatpush.msra.mxu1 %v89_v8  ;;  %v129_v28 = vld [vmem:[%s393_s5] sm:$0xff]  ;;  %s268_s5 = smov [#allocation5]  }
   0xf   :  { %201 = vmatpush.msra.mxu3 %v89_v8  ;;  %157 = vmatpush.msra.mxu2 %v134_v16  ;;  %v211_v29 = vld [vmem:[%s392_s4] ss:$0 sm:$0xff]  ;;  %s177_s4 = sshll.u32 %s268_s5, 4  ;;  %s178_s4 = int_to_ptr.vmem [resolvable:$true] %s177_s4 }
  0x10   :  { %116 = vmatpush.msra.mxu1 %v88_v9  ;;  %v212_v36 = vld [vmem:[%s394_s6] ss:$0 sm:$0xff] }
  0x11   :  { %202 = vmatpush.msra.mxu3 %v88_v9  ;;  %158 = vmatpush.msra.mxu2 %v133_v17 }
  0x12   :  { %117 = vmatpush.msra.mxu1 %v87_v11 }
  0x13   :  { %203 = vmatpush.msra.mxu3 %v87_v11  ;;  %159 = vmatpush.msra.mxu2 %v132_v18 }
  0x14   :  { %118 = vmatpush.msra.mxu1 %v86_v12 }
  0x15   :  { %204 = vmatpush.msra.mxu3 %v86_v12  ;;  %160 = vmatpush.msra.mxu2 %v131_v26 }
  0x16   :  { %193 = vmatmul.msk.f32.gmra.mxu0 %vm53_vm0, %v44_v10  ;;  %119 = vmatpush.msra.mxu1 %v85_v13 }
  0x17   :  { %205 = vmatpush.msra.mxu3 %v85_v13  ;;  %161 = vmatpush.msra.mxu2 %v130_v27 }
  0x19   :  { %162 = vmatpush.msra.mxu2 %v129_v28 }
  0x8b   :  { %v77_v20 = vpop.f32.mrf.mxu0 }
  0x8c   :  { %v78_v21 = vadd.f32 %v210_v19, %v77_v20 }
  0x8e   :  { %v83_v22 = vmax.f32 %v78_v21, 0.0 }
  0x90   :  { %194 = vmatmul.msk.f32.vlgmr.msra.gmra.mxu1 %vm97_vm1, %v83_v22 }
  0x93   :  { %v80_v23 = vpop.f32.mrf.mxu0 }
  0x94   :  { %v81_v24 = vadd.f32 %v210_v19, %v80_v23 }
  0x96   :  { %v84_v25 = vmax.f32 %v81_v24, 0.0 }
  0x98   :  { %195 = vmatmul.msk.f32.vlgmr.msra.gmra.mxu3 %vm97_vm1, %v84_v25 }
 0x10d   :  { %v121_v30 = vpop.f32.mrf.mxu1 }
 0x10e   :  { %v122_v31 = vadd.f32 %v211_v29, %v121_v30 }
 0x110   :  { %v127_v32 = vmax.f32 %v122_v31, 0.0 }
 0x112   :  { %196 = vmatmul.msk.f32.vlgmr.msra.gmra.mxu2 %vm97_vm1, %v127_v32 }
 0x11b   :  { %v124_v33 = vpop.f32.mrf.mxu3 }
 0x11c   :  { %v125_v34 = vadd.f32 %v211_v29, %v124_v33 }
 0x11e   :  { %v128_v35 = vmax.f32 %v125_v34, 0.0 }
 0x120   :  { %197 = vmatmul.msk.f32.gmra.mxu2 %vm97_vm1, %v128_v35 }
 0x195   :  { %v164_v37 = vpop.f32.mrf.mxu2 }
 0x196   :  { %v165_v38 = vadd.f32 %v212_v36, %v164_v37 }
 0x198   :  { %171 = vst.msk [vmem:[#allocation5] sm:$0xff] %vm170_vm2, %v165_v38 }
 0x1a3   :  { %v167_v39 = vpop.f32.mrf.mxu2 }
 0x1a4   :  { %v168_v40 = vadd.f32 %v212_v36, %v167_v39 }
 0x1a6   :  { %172 = vst.msk [vmem:[#allocation5 + $0x8] sm:$0xff] %vm170_vm2, %v168_v40 }
 0x1a7   :  { %185 = dma.vmem_to_hbm [thread:$0]  %s178_s4, 256, %s180_s26, [#allocation4], %s266_s29, %s266_s29, %s267_s30  }
 0x1a8   :  { %263 = dma.done.wait [#allocation4], 256  }
 0x1a9   :  { %264 = vsyncadd [#allocation4], 4294967040 }
 0x1aa   :  { %190 = vsyncpa [#allocation3], 1 }
 0x1ab   :  { %191 = vsyncpa [#allocation4], 1 }

</bundles_post_ra>
